<compile_context>
chip_gen: v5e
topology: v5e:2x2
jax: 0.10.0
libtpu: 0.0.40
codegen_flags: <defaults>
</compile_context>

<pallas_src>
import functools

import jax
import jax.numpy as jnp
from jax.experimental import pallas as pl
from jax.experimental.pallas import tpu as pltpu

_LANE = 128
_MAX_TILE = 128 * 1024              # max pixels per grid step (lane axis)
_WORKSET_F32_BYTES = 3 * 1024 * 1024  # budget for ONE (C, tile) f32 working array;
                                      # peak VMEM ~ a handful of these + 2x input
_MIN_GRID_STEPS = 8                 # keep several grid steps so both v7x TCs get work
_VMEM_LIMIT = 32 * 1024 * 1024      # raise v5e's 16 MiB scoped default; equals the
                                    # v6e/v7x defaults and is <= physical on all gens


def _round_up(x, m):
    return ((x + m - 1) // m) * m


def _cdiv(a, b):
    return -(-a // b)


def _choose_tile(hw_arr, c, b):
    """Pixel-tile width (multiple of 128, never exceeding the array) and #tiles."""
    # Budget-driven: one (C, tile) f32 temp <= _WORKSET_F32_BYTES keeps the whole
    # in-kernel working set comfortably inside the 32 MiB scoped-VMEM limit.
    tile = _WORKSET_F32_BYTES // max(1, c * 4)
    tile = max(_LANE, min(_MAX_TILE, (tile // _LANE) * _LANE))
    # Never let a block exceed the (unpadded) lane extent; the ragged remainder
    # of the final block is handled by the in-kernel mask.
    tile = min(tile, max(_LANE, (hw_arr // _LANE) * _LANE))
    # Ensure enough grid steps for megacore sharding (v7x has 2 TensorCores).
    if b * _cdiv(hw_arr, tile) < _MIN_GRID_STEPS and tile > _LANE:
        want_tiles = _cdiv(_MIN_GRID_STEPS, max(b, 1))
        tile = max(_LANE, _round_up(_cdiv(hw_arr, want_tiles), _LANE))
    return tile, _cdiv(hw_arr, tile)


def _wce_kernel(logits_ref, labels_ref, weight_ref, num_ref, den_ref, *,
                hw, tile, num_classes, label_smoothing, ignore_index):
    x = logits_ref[0].astype(jnp.float32)          # (C, T): classes on sublanes
    labels = labels_ref[0]                         # (1, T) int32
    w = weight_ref[...].astype(jnp.float32)        # (C, 1)

    # Lane validity: inside the real (unpadded) pixel extent AND not ignored.
    # Out-of-bounds lanes of the ragged final block hold unspecified data, so
    # everything is masked with jnp.where (select) — NaN/Inf garbage in masked
    # lanes cannot leak into the partial sums.
    col = pl.program_id(1) * tile + jax.lax.broadcasted_iota(jnp.int32, labels.shape, 1)
    valid = jnp.logical_and(labels != ignore_index, col < hw)          # (1, T)

    onehot = jax.lax.broadcasted_iota(jnp.int32, x.shape, 0) == labels  # (C, T)
    wb = jnp.broadcast_to(w, x.shape)              # hoisted: broadcast done once

    # numerically stable log-sum-exp over the short (sublane) class axis
    m = jnp.max(x, axis=0, keepdims=True)                               # (1, T)
    lse = m + jnp.log(jnp.sum(jnp.exp(x - m), axis=0, keepdims=True))   # (1, T)

    picked = jnp.sum(jnp.where(onehot, x, 0.0), axis=0, keepdims=True)  # x[label]
    w_y = jnp.sum(jnp.where(onehot, wb, 0.0), axis=0, keepdims=True)    # w[label]

    contrib = w_y * (lse - picked)
    if label_smoothing:  # static python branch — skipped entirely when eps == 0
        wx = jnp.sum(wb * x, axis=0, keepdims=True)                     # Σ_c w_c x_c
        w_sum = jnp.sum(w)
        contrib = ((1.0 - label_smoothing) * contrib
                   + (label_smoothing / num_classes) * (lse * w_sum - wx))

    # In-kernel tile reduction -> per-tile scalar partials.
    num_s = jnp.sum(jnp.where(valid, contrib, 0.0))
    den_s = jnp.sum(jnp.where(valid, w_y, 0.0))

    # One lane-dense 128-wide row per tile: the scalar sits at lane 0, exact
    # zeros elsewhere, so the tiny XLA-side jnp.sum over the partial arrays
    # yields the exact totals with a single unmasked 128-lane store per output.
    lane = jax.lax.broadcasted_iota(jnp.int32, (1, _LANE), 1)
    num_ref[0] = jnp.where(lane == 0, num_s, 0.0)
    den_ref[0] = jnp.where(lane == 0, den_s, 0.0)


def weighted_ce_loss(pred, gt, ce_weights, label_smoothing=0.0, ignore_index=-100):
    """pred: [B, C, *spatial] (or [N, C]) logits; gt: matching int class ids."""
    if pred.ndim == 2:
        # TODO(synk): a classes-on-lanes kernel variant would avoid this XLA
        # transpose for vocabulary-scale C on the [N, C] path.
        pred = jnp.transpose(pred)[None]           # [N, C] -> [1, C, N]
        gt = gt[None]
    b, c = int(pred.shape[0]), int(pred.shape[1])
    hw = 1
    for d in pred.shape[2:]:
        hw *= int(d)

    logits = pred.reshape(b, c, hw)                # free reshape; keep input dtype
    labels = gt.reshape(b, 1, hw).astype(jnp.int32)

    if hw < _LANE:
        # Tiny-input corner case only: make the lane extent one full vreg so no
        # block exceeds the array.  Cost is negligible at this size.
        pad = _LANE - hw
        logits = jnp.pad(logits, ((0, 0), (0, 0), (0, pad)))
        labels = jnp.pad(labels, ((0, 0), (0, 0), (0, pad)),
                         constant_values=ignore_index)
    hw_arr = int(logits.shape[-1])

    tile, n_tiles = _choose_tile(hw_arr, c, b)
    weight = jnp.asarray(ce_weights, dtype=jnp.float32).reshape(c, 1)

    kernel = functools.partial(
        _wce_kernel, hw=hw, tile=tile, num_classes=c,
        label_smoothing=float(label_smoothing), ignore_index=int(ignore_index))

    num_p, den_p = pl.pallas_call(
        kernel,
        out_shape=(jax.ShapeDtypeStruct((b, 1, n_tiles * _LANE), jnp.float32),
                   jax.ShapeDtypeStruct((b, 1, n_tiles * _LANE), jnp.float32)),
        grid_spec=pltpu.PrefetchScalarGridSpec(
            num_scalar_prefetch=0,
            grid=(b, n_tiles),
            in_specs=[
                pl.BlockSpec((1, c, tile), lambda bb, i: (bb, 0, i)),
                pl.BlockSpec((1, 1, tile), lambda bb, i: (bb, 0, i)),
                pl.BlockSpec((c, 1), lambda bb, i: (0, 0)),
            ],
            out_specs=[
                pl.BlockSpec((1, 1, _LANE), lambda bb, i: (bb, 0, i)),
                pl.BlockSpec((1, 1, _LANE), lambda bb, i: (bb, 0, i)),
            ],
        ),
        compiler_params=pltpu.CompilerParams(
            dimension_semantics=("parallel", "parallel"),
            vmem_limit_bytes=_VMEM_LIMIT),
    )(logits, labels, weight)

    num = jnp.sum(num_p)
    den = jnp.sum(den_p)
    # PyTorch yields NaN if every target is ignored; return 0 instead so a
    # training step never propagates NaN (documented divergence).
    return jnp.where(den != 0, num / den, jnp.float32(0.0))


class WeightedCELoss:
    """Mirror of the PyTorch weighted_ce_loss module (device .to() is a no-op in JAX)."""

    def __init__(self, ce_weights, label_smoothing=0.0, ignore_index=-100):
        self.ce_weights = jnp.asarray(ce_weights, dtype=jnp.float32)
        self.label_smoothing = float(label_smoothing)
        self.ignore_index = int(ignore_index)

    def __call__(self, pred, gt):
        return weighted_ce_loss(pred, gt, self.ce_weights,
                                self.label_smoothing, self.ignore_index)


def _weighted_ce_ref(pred, gt, w, label_smoothing, ignore_index):
    """Plain-JAX reference with identical semantics."""
    c = pred.shape[1]
    x = jnp.moveaxis(pred, 1, -1).reshape(-1, c).astype(jnp.float32)
    y = gt.reshape(-1)
    valid = y != ignore_index
    y_safe = jnp.where(valid, y, 0)
    logp = jax.nn.log_softmax(x, axis=-1)
    w = jnp.asarray(w, jnp.float32)
    w_y = w[y_safe]
    nll = -jnp.take_along_axis(logp, y_safe[:, None], axis=-1)[:, 0]
    smooth = -jnp.sum(logp * w[None, :], axis=-1)
    per = (1.0 - label_smoothing) * w_y * nll + (label_smoothing / c) * smooth
    num = jnp.sum(jnp.where(valid, per, 0.0))
    den = jnp.sum(jnp.where(valid, w_y, 0.0))
    return num / den


if __name__ == "__main__":
    key = jax.random.PRNGKey(0)
    kp, kg, km, kp2, kg2 = jax.random.split(key, 5)

    B, C, H, W = 2, 4, 16, 16
    ignore_index = -100
    label_smoothing = 0.1
    ce_weights = jnp.array([0.5, 1.0, 1.5, 2.0], dtype=jnp.float32)

    pred = jax.random.normal(kp, (B, C, H, W), dtype=jnp.float32)
    gt = jax.random.randint(kg, (B, H, W), 0, C).astype(jnp.int32)
    gt = jnp.where(jax.random.bernoulli(km, 0.1, (B, H, W)), ignore_index, gt)

    loss_fn = WeightedCELoss(ce_weights, label_smoothing, ignore_index)
    loss = jax.block_until_ready(loss_fn(pred, gt))
    want = _weighted_ce_ref(pred, gt, ce_weights, label_smoothing, ignore_index)
    assert bool(jnp.isfinite(loss)), "loss is not finite"
    assert jnp.allclose(loss, want, atol=1e-5, rtol=1e-5), (loss, want)

    # non-128-aligned spatial extent exercises the ragged-block / lane-mask path
    pred2 = jax.random.normal(kp2, (B, C, 7, 9), dtype=jnp.float32)
    gt2 = jax.random.randint(kg2, (B, 7, 9), 0, C).astype(jnp.int32)
    loss2 = jax.block_until_ready(loss_fn(pred2, gt2))
    want2 = _weighted_ce_ref(pred2, gt2, ce_weights, label_smoothing, ignore_index)
    assert jnp.allclose(loss2, want2, atol=1e-5, rtol=1e-5), (loss2, want2)

    print("KERNEL_OK")
</pallas_src>

<mosaic_0001>
module attributes {stable_mosaic.version = 11 : i64} {
  func.func @_wce_kernel(%arg0: i32, %arg1: i32, %arg2: memref<1x4x128xf32, #tpu.memory_space<vmem>>, %arg3: memref<1x1x128xi32, #tpu.memory_space<vmem>>, %arg4: memref<4x1xf32, #tpu.memory_space<vmem>>, %arg5: memref<1x1x128xf32, #tpu.memory_space<vmem>>, %arg6: memref<1x1x128xf32, #tpu.memory_space<vmem>>) attributes {dimension_semantics = [#tpu.dimension_semantics<parallel>, #tpu.dimension_semantics<parallel>], iteration_bounds = array<i64: 2, 2>, scalar_prefetch = 0 : i64, scratch_operands = 0 : i64, tpu.core_type = #tpu.core_type<tc>, window_params = [{transform_indices = @transform_0, window_bounds = array<i64: 1, 4, 128>}, {transform_indices = @transform_1, window_bounds = array<i64: 1, 1, 128>}, {pipeline_mode = #tpu.pipeline_mode<synchronous>, transform_indices = @transform_2, window_bounds = array<i64: 4, 1>}, {transform_indices = @transform_3, window_bounds = array<i64: 1, 1, 128>}, {transform_indices = @transform_4, window_bounds = array<i64: 1, 1, 128>}]} {
    %c0 = arith.constant 0 : index
    %c0_0 = arith.constant 0 : index
    %c0_1 = arith.constant 0 : index
    %0 = vector.load %arg2[%c0, %c0_0, %c0_1] : memref<1x4x128xf32, #tpu.memory_space<vmem>>, vector<1x4x128xf32>
    %1 = vector.shape_cast %0 : vector<1x4x128xf32> to vector<4x128xf32>
    %c0_2 = arith.constant 0 : index
    %c0_3 = arith.constant 0 : index
    %c0_4 = arith.constant 0 : index
    %2 = vector.load %arg3[%c0_2, %c0_3, %c0_4] : memref<1x1x128xi32, #tpu.memory_space<vmem>>, vector<1x1x128xi32>
    %3 = vector.shape_cast %2 : vector<1x1x128xi32> to vector<1x128xi32>
    %c0_5 = arith.constant 0 : index
    %c0_6 = arith.constant 0 : index
    %4 = vector.load %arg4[%c0_5, %c0_6] : memref<4x1xf32, #tpu.memory_space<vmem>>, vector<4x1xf32>
    %c128_i32 = arith.constant 128 : i32
    %5 = arith.muli %arg1, %c128_i32 : i32
    %6 = tpu.iota {dimensions = array<i32: 1>} : vector<1x128xi32>
    %7 = vector.broadcast %5 : i32 to vector<1x128xi32>
    %8 = arith.addi %7, %6 : vector<1x128xi32>
    %c-100_i32 = arith.constant -100 : i32
    %9 = vector.broadcast %c-100_i32 : i32 to vector<1x128xi32>
    %10 = arith.cmpi ne, %3, %9 : vector<1x128xi32>
    %c256_i32 = arith.constant 256 : i32
    %11 = vector.broadcast %c256_i32 : i32 to vector<1x128xi32>
    %12 = arith.cmpi slt, %8, %11 : vector<1x128xi32>
    %13 = arith.andi %10, %12 : vector<1x128xi1>
    %14 = tpu.iota {dimensions = array<i32: 0>} : vector<4x128xi32>
    %15 = vector.broadcast %3 : vector<1x128xi32> to vector<4x128xi32>
    %16 = arith.cmpi eq, %14, %15 : vector<4x128xi32>
    %17 = vector.shape_cast %4 : vector<4x1xf32> to vector<4x1xf32>
    %18 = vector.broadcast %17 : vector<4x1xf32> to vector<4x128xf32>
    %cst = arith.constant dense<0xFF800000> : vector<128xf32>
    %19 = vector.multi_reduction <maximumf>, %1, %cst [0] : vector<4x128xf32> to vector<128xf32>
    %20 = vector.shape_cast %19 : vector<128xf32> to vector<1x128xf32>
    %21 = vector.broadcast %20 : vector<1x128xf32> to vector<4x128xf32>
    %22 = arith.subf %1, %21 : vector<4x128xf32>
    %23 = math.exp %22 : vector<4x128xf32>
    %cst_7 = arith.constant dense<0.000000e+00> : vector<128xf32>
    %24 = vector.multi_reduction <add>, %23, %cst_7 [0] : vector<4x128xf32> to vector<128xf32>
    %25 = vector.shape_cast %24 : vector<128xf32> to vector<1x128xf32>
    %26 = math.log %25 : vector<1x128xf32>
    %27 = arith.addf %20, %26 : vector<1x128xf32>
    %cst_8 = arith.constant 0.000000e+00 : f32
    %28 = vector.broadcast %cst_8 : f32 to vector<4x128xf32>
    %29 = arith.select %16, %1, %28 : vector<4x128xi1>, vector<4x128xf32>
    %cst_9 = arith.constant dense<0.000000e+00> : vector<128xf32>
    %30 = vector.multi_reduction <add>, %29, %cst_9 [0] : vector<4x128xf32> to vector<128xf32>
    %31 = vector.shape_cast %30 : vector<128xf32> to vector<1x128xf32>
    %cst_10 = arith.constant 0.000000e+00 : f32
    %32 = vector.broadcast %cst_10 : f32 to vector<4x128xf32>
    %33 = arith.select %16, %18, %32 : vector<4x128xi1>, vector<4x128xf32>
    %cst_11 = arith.constant dense<0.000000e+00> : vector<128xf32>
    %34 = vector.multi_reduction <add>, %33, %cst_11 [0] : vector<4x128xf32> to vector<128xf32>
    %35 = vector.shape_cast %34 : vector<128xf32> to vector<1x128xf32>
    %36 = arith.subf %27, %31 : vector<1x128xf32>
    %37 = arith.mulf %35, %36 : vector<1x128xf32>
    %38 = arith.mulf %18, %1 : vector<4x128xf32>
    %cst_12 = arith.constant dense<0.000000e+00> : vector<128xf32>
    %39 = vector.multi_reduction <add>, %38, %cst_12 [0] : vector<4x128xf32> to vector<128xf32>
    %40 = vector.shape_cast %39 : vector<128xf32> to vector<1x128xf32>
    %41 = vector.shape_cast %4 : vector<4x1xf32> to vector<1x4x1xf32>
    %cst_13 = arith.constant dense<0.000000e+00> : vector<1xf32>
    %42 = vector.multi_reduction <add>, %41, %cst_13 [1, 2] : vector<1x4x1xf32> to vector<1xf32>
    %43 = vector.shape_cast %42 : vector<1xf32> to vector<1x1x1xf32>
    %44 = vector.extract %43[0, 0, 0] : f32 from vector<1x1x1xf32>
    %cst_14 = arith.constant 0.899999976 : f32
    %45 = vector.broadcast %cst_14 : f32 to vector<1x128xf32>
    %46 = arith.mulf %45, %37 : vector<1x128xf32>
    %47 = vector.broadcast %44 : f32 to vector<1x128xf32>
    %48 = arith.mulf %27, %47 : vector<1x128xf32>
    %49 = arith.subf %48, %40 : vector<1x128xf32>
    %cst_15 = arith.constant 2.500000e-02 : f32
    %50 = vector.broadcast %cst_15 : f32 to vector<1x128xf32>
    %51 = arith.mulf %50, %49 : vector<1x128xf32>
    %52 = arith.addf %46, %51 : vector<1x128xf32>
    %cst_16 = arith.constant 0.000000e+00 : f32
    %53 = vector.broadcast %cst_16 : f32 to vector<1x128xf32>
    %54 = arith.select %13, %52, %53 : vector<1x128xi1>, vector<1x128xf32>
    %55 = vector.shape_cast %54 : vector<1x128xf32> to vector<1x1x128xf32>
    %cst_17 = arith.constant dense<0.000000e+00> : vector<1xf32>
    %56 = vector.multi_reduction <add>, %55, %cst_17 [1, 2] : vector<1x1x128xf32> to vector<1xf32>
    %57 = vector.shape_cast %56 : vector<1xf32> to vector<1x1x1xf32>
    %58 = vector.extract %57[0, 0, 0] : f32 from vector<1x1x1xf32>
    %cst_18 = arith.constant 0.000000e+00 : f32
    %59 = vector.broadcast %cst_18 : f32 to vector<1x128xf32>
    %60 = arith.select %13, %35, %59 : vector<1x128xi1>, vector<1x128xf32>
    %61 = vector.shape_cast %60 : vector<1x128xf32> to vector<1x1x128xf32>
    %cst_19 = arith.constant dense<0.000000e+00> : vector<1xf32>
    %62 = vector.multi_reduction <add>, %61, %cst_19 [1, 2] : vector<1x1x128xf32> to vector<1xf32>
    %63 = vector.shape_cast %62 : vector<1xf32> to vector<1x1x1xf32>
    %64 = vector.extract %63[0, 0, 0] : f32 from vector<1x1x1xf32>
    %65 = tpu.iota {dimensions = array<i32: 1>} : vector<1x128xi32>
    %c0_i32 = arith.constant 0 : i32
    %66 = vector.broadcast %c0_i32 : i32 to vector<1x128xi32>
    %67 = arith.cmpi eq, %65, %66 : vector<1x128xi32>
    %cst_20 = arith.constant 0.000000e+00 : f32
    %68 = vector.broadcast %58 : f32 to vector<1x128xf32>
    %69 = vector.broadcast %cst_20 : f32 to vector<1x128xf32>
    %70 = arith.select %67, %68, %69 : vector<1x128xi1>, vector<1x128xf32>
    %c0_21 = arith.constant 0 : index
    %c0_22 = arith.constant 0 : index
    %c0_23 = arith.constant 0 : index
    %71 = vector.load %arg5[%c0_21, %c0_22, %c0_23] : memref<1x1x128xf32, #tpu.memory_space<vmem>>, vector<1x1x128xf32>
    %72 = vector.shape_cast %71 : vector<1x1x128xf32> to vector<1x128xf32>
    %73 = vector.shape_cast %70 : vector<1x128xf32> to vector<1x1x128xf32>
    tpu.vector_store %arg5[%c0_21, %c0_22, %c0_23], %73 {strides = array<i32>} : memref<1x1x128xf32, #tpu.memory_space<vmem>>, vector<1x1x128xf32>,
    %c0_i32_24 = arith.constant 0 : i32
    %74 = vector.broadcast %c0_i32_24 : i32 to vector<1x128xi32>
    %75 = arith.cmpi eq, %65, %74 : vector<1x128xi32>
    %cst_25 = arith.constant 0.000000e+00 : f32
    %76 = vector.broadcast %64 : f32 to vector<1x128xf32>
    %77 = vector.broadcast %cst_25 : f32 to vector<1x128xf32>
    %78 = arith.select %75, %76, %77 : vector<1x128xi1>, vector<1x128xf32>
    %c0_26 = arith.constant 0 : index
    %c0_27 = arith.constant 0 : index
    %c0_28 = arith.constant 0 : index
    %79 = vector.load %arg6[%c0_26, %c0_27, %c0_28] : memref<1x1x128xf32, #tpu.memory_space<vmem>>, vector<1x1x128xf32>
    %80 = vector.shape_cast %79 : vector<1x1x128xf32> to vector<1x128xf32>
    %81 = vector.shape_cast %78 : vector<1x128xf32> to vector<1x1x128xf32>
    tpu.vector_store %arg6[%c0_26, %c0_27, %c0_28], %81 {strides = array<i32>} : memref<1x1x128xf32, #tpu.memory_space<vmem>>, vector<1x1x128xf32>,
    return
  }
  func.func @transform_0(%arg0: i32, %arg1: i32) -> (i32, i32, i32) {
    %c0_i32 = arith.constant 0 : i32
    %c0_i32_0 = arith.constant 0 : i32
    return %arg0, %c0_i32, %arg1 : i32, i32, i32
  }
  func.func @transform_1(%arg0: i32, %arg1: i32) -> (i32, i32, i32) {
    %c0_i32 = arith.constant 0 : i32
    %c0_i32_0 = arith.constant 0 : i32
    return %arg0, %c0_i32, %arg1 : i32, i32, i32
  }
  func.func @transform_2(%arg0: i32, %arg1: i32) -> (i32, i32) {
    %c0_i32 = arith.constant 0 : i32
    %c0_i32_0 = arith.constant 0 : i32
    %c0_i32_1 = arith.constant 0 : i32
    return %c0_i32, %c0_i32_0 : i32, i32
  }
  func.func @transform_3(%arg0: i32, %arg1: i32) -> (i32, i32, i32) {
    %c0_i32 = arith.constant 0 : i32
    %c0_i32_0 = arith.constant 0 : i32
    return %arg0, %c0_i32, %arg1 : i32, i32, i32
  }
  func.func @transform_4(%arg0: i32, %arg1: i32) -> (i32, i32, i32) {
    %c0_i32 = arith.constant 0 : i32
    %c0_i32_0 = arith.constant 0 : i32
    return %arg0, %c0_i32, %arg1 : i32, i32, i32
  }
}

</mosaic_0001>

<bundles_post_ra>
// kernel: tpu_custom_call.1
= control target key start
LH: loop header
LB: loop body
LE: loop exit
PB: predicated region body
PF: predicated region fallthrough
CT: control target
= control target key end

     0   :  { %10 = vsyncpa [#allocation3], 0  ;;  %s1035_s0 = inlined_call_operand.hbm [shape: f32[2,4,256], index: 0, kind: input, shape index: {}]   ;;  %s1036_s1 = inlined_call_operand.vmem [shape: s32[2,1,256], index: 1, kind: input, shape index: {}]   ;;  %s1037_s2 = inlined_call_operand.vmem [shape: f32[4,1], index: 2, kind: input, shape index: {}]   ;;  %s1038_s3 = inlined_call_operand.hbm [shape: f32[2,1,256], index: 3, kind: output, shape index: {0}]   ;;  %s1039_s4 = inlined_call_operand.hbm [shape: f32[2,1,256], index: 4, kind: output, shape index: {1}]  }
   0x1   :  { %12 = vsyncpa [#allocation3 + $0x1], 0 }
   0x2   :  { %13 = vsyncpa [#allocation4], 0 }
   0x3   :  { %15 = vsyncpa [#allocation4 + $0x1], 0 }
   0x4   :  { %16 = vsyncpa [#allocation7], 0 }
   0x5   :  { %18 = vsyncpa [#allocation7 + $0x1], 0  ;;  %s845_s15 = smov 0   ;;  %s847_s16 = smov 0  }
   0x6   :  { %s849_s17 = smov 0   ;;  %s851_s18 = smov 0  }
   0x7   :  { %s853_s19 = smov 0   ;;  %s855_s20 = smov 0  }
   0x8   :  { %s857_s21 = smov 0   ;;  %s859_s22 = smov 0  }
   0x9 LB: > { %s546_s23 = sadd.s32 4294967295, %s817_s22   ;;  %s547_s24 = sadd.s32 4294967294, %s817_s22   ;;  %s817_s22 = sphi %s859_s22, %s24_s22   ;;  %s813_s21 = sphi %s857_s21, %s1056_s21   ;;  %s809_s20 = sphi %s855_s20, %s1055_s20   ;;  %s805_s19 = sphi %s853_s19, %s1054_s19   ;;  %s801_s18 = sphi %s851_s18, %s1053_s18   ;;  %s797_s17 = sphi %s849_s17, %s1052_s17   ;;  %s793_s16 = sphi %s847_s16, %s1051_s16   ;;  %s789_s15 = sphi %s845_s15, %s1050_s15  }
   0xa   : > { %s33_s25 = sadd.s32 1, %s809_s20  ;;  %s36_s26 = sadd.s32 1, %s813_s21 }
   0xb   : > { %p34_p0 = scmp.ge.s32.totalorder %s33_s25, 2  ;;  %s45_s27 = sadd.s32 1, %s797_s17 }
   0xc   : > { %p52_p1 = scmp.ne.s32.totalorder %s797_s17, %s793_s16  ;;  %p53_p2 = scmp.eq.s32.totalorder %s817_s22, 0 }
   0xd   : > { %s1058_s25 = smov (%p34_p0, %s33_s25), 0  ;;  %s1060_s26 = smov (!%p34_p0, %s36_s26), %s813_s21 }
   0xe   : > { %1042 = sst [smem:[#allocation11_spill]] %s1058_s25  ;;  %s41_s28 = ssub.s32 %s809_s20, %s1058_s25 }
   0xf   : > { %p898_p3 = por %p53_p2, %p52_p1  ;;  %p38_p4 = scmp.ge.s32.totalorder %s1060_s26, 2 }
  0x10   : > { %p58_p5 = scmp.ne.s32.totalorder %s793_s16, %s789_s15  ;;  %p59_p6 = scmp.eq.s32.totalorder %s546_s23, 0 }
  0x11   : > { %p133_p7 = scmp.eq.s32.totalorder %s546_s23, 3  ;;  %s1062_s26 = smov (%p38_p4, %s1060_s26), 0 }
  0x12   : > { %1044 = sst [smem:[#allocation12_spill]] %s1062_s26  ;;  %p906_p8 = por %p59_p6, %p58_p5 }
  0x13   : > { %p910_p9 = por %p133_p7, %p52_p1  ;;  %s40_s6 = ssub.s32 %s813_s21, %s1062_s26 }
  0x14   : > { %p139_p10 = scmp.eq.s32.totalorder %s547_s24, 3  ;;  %s42_s7 = sor.u32 %s41_s28, %s40_s6 }
  0x15   : > { %p43_p11 = scmp.eq.s32.totalorder %s42_s7, 0  ;;  %p584_p13 = scmp.lt.s32.totalorder %s817_s22, 4 }
  0x16   : > { %p916_p12 = por %p139_p10, %p58_p5  ;;  %s190_s9 = sand.u32 1, %s797_s17  }
  0x17   : > { %s923_s10 = scalar_select %p43_p11, %s797_s17, %s45_s27  }
  0x18   : > { %s550_s11 = sshll.u32 %s190_s9, 2  ;;  %s551_s12 = sshll.u32 %s813_s21, 1 }
  0x19   : > { %s198_s13 = sadd.s32 %s809_s20, %s551_s12  ;;  %s194_s14 = scalar_lea.vmem [#allocation2], %s550_s11 }
  0x1a   : > { %s204_s23 = sshll.u32 %s194_s14, 4  ;;  %s552_s26 = sshll.u32 %s198_s13, 2  ;;  %s205_s23 = int_to_ptr.vmem [resolvable:$true] %s204_s23 }
  0x1b   : > { %s200_s6 = scalar_lea.hbm %s1035_s0, %s552_s26  ;;  %p574_p0 = pnand %p584_p13, %p898_p3 }
  0x1c   : > { %s202_s7 = sshll.u32 %s200_s6, 4  ;;  %p553_p1 = scmp.ge.s32.totalorder %s817_s22, 1  ;;  %s203_s7 = int_to_ptr.hbm [resolvable:$true] %s202_s7 }
  0x1d   : > { %s191_s25 = scalar_lea.sflag [#allocation3], %s190_s9  ;;  %p219_p2 = scmp.lt.s32.totalorder %s817_s22, 5 }
  0x1e   : > { %576 = dma.hbm_to_vmem [thread:$0]  (!%p574_p0), %s203_s7, 64, %s205_s23, %s191_s25  }
  0x1f   : > { %p220_p4 = pnand %p553_p1, %p219_p2 }
  0x20   : > { %s935_s27 = sand.u32 (!%p220_p4), 1, %s793_s16  }
  0x21   : > { %223 = sbr.rel (%p220_p4) target bundleno = 427 (0x1ab), region = 32  ;;  %s554_s11 = sshll.u32 (!%p220_p4), %s935_s27, 2 }
  0x22   : > { %s226_s12 = scalar_lea.sflag (!%p220_p4), [#allocation3], %s935_s27  ;;  %s229_s13 = scalar_lea.vmem (!%p220_p4), [#allocation2], %s554_s11 }
  0x26   : > { %776 = dma.done.wait (%p906_p8), %s226_s12, 64  }
  0x27   : > { %778 = vsyncadd (%p906_p8), %s226_s12, 4294967232  ;;  %v819_v0 = vmov 0   ;;  %vm339_vm0 = vcmask 3072   ;;  %v274_v1 = vld [vmem:[%s1037_s2] sm:$0xf]  ;;  %vm292_vm1 = vcmask 1043456   ;;  %v276_v22 = vlaneseq }
  0x28   : > { %651 = vset.pattern.permute.xlu0 %v819_v0  ;;  %v340_v2 = vsel %vm339_vm0, %v274_v1, 0.0  ;;  %v272_v3 = vld [vmem:[%s229_s13] sm:$0xf]  ;;  %p265_p3 = scmp.lt.s32.totalorder %s805_s19, 1  ;;  %p267_p5 = scmp.lt.s32.totalorder %s801_s18, 1  ;;  %vm357_vm6 = vcmask 1040384  }
  0x29   : > { %341 = vadd.xlane.f32.xlu0 %v340_v2  ;;  %v293_v4 = vsel %vm292_vm1, %v272_v3, -inf  ;;  %v284_v24 = vshrl.u32 %v276_v22, 7  ;;  %s556_s6 = sshll.u32 %s801_s18, 7  ;;  %v962_v59 = vand.u32 127, %v276_v22  ;;  %s557_s11 = sshll.u32 %s805_s19, 1 }
  0x2a   : > { %v294_v5 = vrot.slane %v293_v4, 4  ;;  %s266_s29 = scalar_select %p265_p3, %s805_s19, 1  ;;  %v278_v60 = vstv %s556_s6 }
  0x2b   : > { %s268_s30 = scalar_select %p267_p5, %s801_s18, 1  ;;  %v279_v0 = vadd.s32 %v278_v60, %v962_v59  ;;  %vm379_vm7 = vcmp.eq.s32.totalorder %v962_v59, 0 }
  0x2c   : > { %v295_v6 = vmax.f32 %v293_v4, %v294_v5  ;;  %s555_s9 = sshll.u32 %s266_s29, 1  ;;  %s968_s12 = sadd.s32 %s801_s18, %s557_s11 }
  0x2d   : > { %s270_s14 = sadd.s32 %s555_s9, %s268_s30  ;;  %vm281_vm4 = vcmp.lt.s32.totalorder %v279_v0, 256  ;;  %s401_s26 = scalar_lea.hbm %s1038_s3, %s968_s12 }
  0x2e   : > { %v296_v7 = vrot.slane %v295_v6, 2  ;;  %s955_s28 = scalar_lea.vmem %s1036_s1, %s270_s14  ;;  %s258_s29 = scalar_lea.vmem [#allocation5], %s935_s27 }
  0x2f   : > { %v652_v25 = vld [vmem:[%s955_s28] ss:$0 sm:$0xff]  ;;  %s403_s30 = sshll.u32 %s258_s29, 4  ;;  %s405_s9 = sshll.u32 %s401_s26, 4  ;;  %s404_s30 = int_to_ptr.vmem [resolvable:$true] %s403_s30  ;;  %s406_s9 = int_to_ptr.hbm [resolvable:$true] %s405_s9 }
  0x30   : > { %v297_v8 = vmax.f32 %v295_v6, %v296_v7  ;;  %vm286_vm2 = vcmp.eq.s32.totalorder %v284_v24, %v652_v25  ;;  %v273_v2 = vld [vmem:[%s955_s28] sm:$0x1]  ;;  %s416_s23 = scalar_lea.hbm %s1039_s4, %s968_s12  ;;  %s387_s24 = scalar_lea.sflag [#allocation4], %s935_s27 }
  0x31   : > { %v313_v28 = vsel %vm286_vm2, %v272_v3, 0.0  ;;  %vm280_vm3 = vcmp.ne.s32.totalorder %v273_v2, 4294967196  ;;  %s701_s28 = sshra.s32 %s406_s9, 4  ;;  %s707_s13 = scalar_lea.hbm %s1038_s3, 4  ;;  %s702_s28 = int_to_ptr.hbm [resolvable:$true] %s701_s28 }
  0x32   : > { %v298_v9 = vrot.slane %v297_v8, 1  ;;  %v314_v31 = vsel %vm292_vm1, %v313_v28, 0.0  ;;  %vm282_vm5 = vmand %vm280_vm3, %vm281_vm4  ;;  %s703_s6 = scalar_lea.hbm %s702_s28, 1  ;;  %p708_p10 = scmp.lt.s32.totalorder %s702_s28, %s1038_s3 }
  0x33   : > { %v315_v34 = vrot.slane %v314_v31, 4  ;;  %p704_p6 = scmp.ne.s32.totalorder %s702_s28, %s703_s6  ;;  %p709_p11 = scmp.lt.s32.totalorder %s707_s13, %s703_s6 }
  0x34   : > { %v299_v10 = vmax.f32 %v297_v8, %v298_v9 }
  0x35   : > { %v316_v38 = vadd.f32 %v315_v34, %v314_v31  ;;  %p705_p7 = pnand %p704_p6, %p910_p9  ;;  %p710_p13 = por %p709_p11, %p708_p10 }
  0x36   : > { %v300_v11 = vsub.f32 %v272_v3, %v299_v10 }
  0x37   : > { %v317_v41 = vrot.slane %v316_v38, 2  ;;  %p706_p8 = pneg %p705_p7 }
  0x38   : > { %v301_v15 = vmul.f32 1.442695, %v300_v11 }
  0x39   : > { %v318_v44 = vadd.f32 %v317_v41, %v316_v38  ;;  %p711_p0 = pnand %p710_p13, %p706_p8 }
  0x3a   : > { %653 = vpow2.f32 %v301_v15 }
  0x3b   : > { %v319_v48 = vrot.slane %v318_v44, 1 }
  0x3d   : > { %289 = vperm.xlu0 %651, %v274_v1   ;;  %v320_v55 = vadd.f32 %v319_v48, %v318_v44 }
  0x40   : > { %v654_v20 = vpop.eup %653 }
  0x41   : > { %v303_v21 = vsel %vm292_vm1, %v654_v20, 0.0 }
  0x42   : > { %v304_v23 = vrot.slane %v303_v21, 4 }
  0x44   : > { %v305_v26 = vadd.f32 %v304_v23, %v303_v21 }
  0x46   : > { %v306_v27 = vrot.slane %v305_v26, 2 }
  0x48   : > { %v307_v30 = vadd.f32 %v306_v27, %v305_v26 }
  0x4a   : > { %v308_v33 = vrot.slane %v307_v30, 1 }
  0x4c   : > { %v309_v37 = vadd.f32 %v308_v33, %v307_v30 }
  0x4e   : > { %655 = vlog2.f32 %v309_v37 }
  0x54   : > { %v656_v47 = vpop.eup %655 }
  0x55   : > { %v311_v51 = vmul.f32 0.6931472, %v656_v47 }
  0x57   : > { %v312_v54 = vadd.f32 %v311_v51, %v299_v10 }
  0x59   : > { %v329_v57 = vsub.f32 %v312_v54, %v320_v55 }
  0x9c   : > { %v342_v12 = vpop.xlane.xlu0 %341 }
  0x9d   : > { %v343_v13 = vrot.slane %v342_v12, 4 }
  0x9f   : > { %v344_v14 = vadd.f32 %v343_v13, %v342_v12 }
  0xa1   : > { %v345_v16 = vrot.slane %v344_v14, 2 }
  0xa3   : > { %v346_v17 = vadd.f32 %v345_v16, %v344_v14 }
  0xa5   : > { %v347_v18 = vrot.slane %v346_v17, 1 }
  0xa7   : > { %v348_v19 = vadd.f32 %v347_v18, %v346_v17 }
  0xa9   : > { %561 = vpush %v348_v19 }
  0xaf   : > { %v290_v29 = vpop.permute.xlu0 %289 }
  0xb0   : > { %v321_v32 = vsel %vm286_vm2, %v290_v29, 0.0  ;;  %v331_v36 = vmul.f32 %v290_v29, %v272_v3 }
  0xb1   : > { %v322_v35 = vsel %vm292_vm1, %v321_v32, 0.0 }
  0xb2   : > { %v323_v39 = vrot.slane %v322_v35, 4  ;;  %v332_v40 = vsel %vm292_vm1, %v331_v36, 0.0 }
  0xb3   : > { %v333_v43 = vrot.slane %v332_v40, 4 }
  0xb4   : > { %v324_v42 = vadd.f32 %v323_v39, %v322_v35 }
  0xb5   : > { %v334_v46 = vadd.f32 %v333_v43, %v332_v40 }
  0xb6   : > { %v325_v45 = vrot.slane %v324_v42, 2 }
  0xb7   : > { %v335_v50 = vrot.slane %v334_v46, 2 }
  0xb8   : > { %v326_v49 = vadd.f32 %v325_v45, %v324_v42 }
  0xb9   : > { %v336_v53 = vadd.f32 %v335_v50, %v334_v46 }
  0xba   : > { %v327_v52 = vrot.slane %v326_v49, 1 }
  0xbb   : > { %v337_v58 = vrot.slane %v336_v53, 1 }
  0xbc   : > { %v328_v56 = vadd.f32 %v327_v52, %v326_v49 }
  0xbd   : > { %v338_v62 = vadd.f32 %v337_v58, %v336_v53 }
  0xbe   : > { %v330_v1 = vmul.f32 %v329_v57, %v328_v56  ;;  %v368_v9 = vsel %vm282_vm5, %v328_v56, 0.0 }
  0xbf   : > { %v369_v10 = vsel %vm357_vm6, %v368_v9, 0.0 }
  0xc0   : > { %v350_v5 = vmul.f32 0.9, %v330_v1 }
  0xda   : > { %s562_s7 = spop %561 }
  0xdb   : > { %v351_v61 = vstv %s562_s7 }
  0xdc   : > { %v352_v63 = vmul.f32 %v351_v61, %v312_v54 }
  0xde   : > { %v353_v3 = vsub.f32 %v352_v63, %v338_v62 }
  0xe0   : > { %v354_v4 = vmul.f32 0.025, %v353_v3 }
  0xe2   : > { %v355_v6 = vadd.f32 %v354_v4, %v350_v5 }
  0xe4   : > { %v356_v7 = vsel %vm282_vm5, %v355_v6, 0.0 }
  0xe5   : > { %v358_v8 = vsel %vm357_vm6, %v356_v7, 0.0 }
  0xe6   : > { %359 = vadd.xlane.f32.xlu1 %v358_v8 }
  0xee   : > { %370 = vadd.xlane.f32.xlu1 %v369_v10 }
 0x159   : > { %v360_v11 = vpop.xlane.xlu1 %359 }
 0x15a   : > { %v361_v12 = vrot.slane %v360_v11, 4 }
 0x15c   : > { %v362_v13 = vadd.f32 %v361_v12, %v360_v11 }
 0x15e   : > { %v363_v14 = vrot.slane %v362_v13, 2 }
 0x160   : > { %v364_v15 = vadd.f32 %v363_v14, %v362_v13 }
 0x161   : > { %v371_v16 = vpop.xlane.xlu1 %370 }
 0x162   : > { %v372_v17 = vrot.slane %v371_v16, 4  ;;  %v365_v18 = vrot.slane %v364_v15, 1 }
 0x164   : > { %v373_v19 = vadd.f32 %v372_v17, %v371_v16  ;;  %v366_v20 = vadd.f32 %v365_v18, %v364_v15 }
 0x166   : > { %v374_v21 = vrot.slane %v373_v19, 2  ;;  %563 = vpush %v366_v20 }
 0x168   : > { %v375_v22 = vadd.f32 %v374_v21, %v373_v19 }
 0x16a   : > { %v376_v23 = vrot.slane %v375_v22, 1 }
 0x16c   : > { %v377_v24 = vadd.f32 %v376_v23, %v375_v22 }
 0x16e   : > { %565 = vpush %v377_v24 }
 0x197   : > { %s564_s14 = spop %563 }
 0x198   : > { %v380_v25 = vstv %s564_s14 }
 0x199   : > { %v381_v26 = vsel %vm379_vm7, %v380_v25, 0.0 }
 0x19a   : > { %382 = vst [vmem:[%s258_s29] sm:$0x1] %v381_v26 }
 0x19b   : > { %714 = shalt.err (!%p711_p0)
}
 0x19c   : > { %569 = dma.vmem_to_hbm [thread:$0]  (%p910_p9), %s404_s30, 16, %s406_s9, %s387_s24  }
 0x19d   : > { %s264_s12 = scalar_lea.vmem [#allocation6], %s935_s27  ;;  %s420_s14 = sshll.u32 %s416_s23, 4  ;;  %s421_s14 = int_to_ptr.hbm [resolvable:$true] %s420_s14 }
 0x19e   : > { %s418_s29 = sshll.u32 %s264_s12, 4  ;;  %s391_s19 = scalar_lea.sflag [#allocation7], %s935_s27  ;;  %s419_s29 = int_to_ptr.vmem [resolvable:$true] %s418_s29 }
 0x19f   : > { %s566_s18 = spop %565  ;;  %s729_s28 = sshra.s32 %s421_s14, 4  ;;  %s730_s28 = int_to_ptr.hbm [resolvable:$true] %s729_s28 }
 0x1a0   : > { %v383_v27 = vstv %s566_s18  ;;  %s731_s6 = scalar_lea.hbm %s730_s28, 1  ;;  %s735_s23 = scalar_lea.hbm %s1039_s4, 4 }
 0x1a1   : > { %v384_v28 = vsel %vm379_vm7, %v383_v27, 0.0  ;;  %p732_p1 = scmp.ne.s32.totalorder %s730_s28, %s731_s6  ;;  %p736_p3 = scmp.lt.s32.totalorder %s730_s28, %s1039_s4 }
 0x1a2   : > { %385 = vst [vmem:[%s264_s12] sm:$0x1] %v384_v28  ;;  %p737_p5 = scmp.lt.s32.totalorder %s735_s23, %s731_s6 }
 0x1a3   : > { %p733_p2 = pnand %p732_p1, %p910_p9 }
 0x1a4   : > { %p738_p6 = por %p737_p5, %p736_p3 }
 0x1a5   : > { %p734_p4 = pneg %p733_p2 }
 0x1a7   : > { %p739_p7 = pnand %p738_p6, %p734_p4 }
 0x1a9   : > { %742 = shalt.err (!%p739_p7)
}
 0x1aa   : > { %570 = dma.vmem_to_hbm [thread:$0]  (%p910_p9), %s419_s29, 16, %s421_s14, %s391_s19  }
 0x1ab PF: > { %p585_p8 = scmp.ge.s32.totalorder %s817_s22, 2  ;;  %s432_s27 = sand.u32 1, %s789_s15  }
 0x1ac   : > { %s433_s11 = scalar_lea.sflag [#allocation4], %s432_s27 }
 0x1ad   : > { %p578_p10 = pnand %p585_p8, %p916_p12 }
 0x1af   : > { %p579_p11 = pneg %p578_p10 }
 0x1b1   : > { %780 = dma.done.wait (%p579_p11), %s433_s11, 16  }
 0x1b2   : > { %782 = vsyncadd (%p579_p11), %s433_s11, 4294967280  ;;  %s442_s13 = scalar_lea.sflag [#allocation7], %s432_s27 }
 0x1b3   : > { %784 = dma.done.wait (%p579_p11), %s442_s13, 16  }
 0x1b4   : > { %786 = vsyncadd (%p579_p11), %s442_s13, 4294967280  ;;  %s24_s22 = sadd.s32 1, %s817_s22   ;;  %s1048_s5 = sld [smem:[#allocation11_spill]] }
 0x1b5   : > { %p21_p13 = scmp.ge.s32.totalorder %s24_s22, 6   ;;  %s1049_s25 = sld [smem:[#allocation12_spill]] }
 0x1b6   : > { %s1050_s15 = smov %s793_s16  ;;  %s1051_s16 = smov %s797_s17 }
 0x1b7   : > { %s1052_s17 = smov %s923_s10  ;;  %s1053_s18 = smov %s809_s20 }
 0x1b8   : > { %s1054_s19 = smov %s813_s21  ;;  %23 = sbr.rel (!%p21_p13) target bundleno = 9 (0x9), region = 97 }
 0x1ba   : > { %s1055_s20 = smov %s1048_s5 }
 0x1bb   : > { %s1056_s21 = smov %s1049_s25 }
 0x1bd   :  { %447 = vsyncpa [#allocation3], 1 }
 0x1be   :  { %449 = vsyncpa [#allocation3 + $0x1], 1 }
 0x1bf   :  { %450 = vsyncpa [#allocation4], 1 }
 0x1c0   :  { %452 = vsyncpa [#allocation4 + $0x1], 1 }
 0x1c1   :  { %453 = vsyncpa [#allocation7], 1 }
 0x1c2   :  { %455 = vsyncpa [#allocation7 + $0x1], 1 }

</bundles_post_ra>
